<compile_context>
chip_gen: v7x
topology: tpu7x:2x2x1
jax: 0.10.0
libtpu: 0.0.40
codegen_flags: <defaults>
</compile_context>

<pallas_src>
import functools

import jax
import jax.numpy as jnp
from jax.experimental import pallas as pl
from jax.experimental.pallas import tpu as pltpu

_DEFAULT_TILE_B = 512      # ~128 KiB per f32 hidden activation -> modest spill
_HIDDEN = 64


def _round_up(x, m):
    return ((x + m - 1) // m) * m


def _critic_kernel(obs_ref, w1_ref, b1_ref, w2_ref, b2_ref, w3_ref, b3_ref,
                   out_ref):
    # obs tile: (TILE_B, D) f32, cast to bf16 in-kernel (cheap VPU pack) so the
    # wrapper does not burn an extra HBM pass on the cast.
    x = obs_ref[...].astype(jnp.bfloat16)                          # (TB, D) bf16
    h1 = jnp.dot(x, w1_ref[...], preferred_element_type=jnp.float32)
    h1 = jnp.maximum(h1 + b1_ref[...], 0.0)                        # f32 VPU
    h2 = jnp.dot(h1.astype(jnp.bfloat16), w2_ref[...],
                 preferred_element_type=jnp.float32)
    h2 = jnp.maximum(h2 + b2_ref[...], 0.0)                        # f32 VPU
    # Value head: (TB,64) * (1,64) on the VPU + cross-lane sum on the XLU,
    # plus the scalar output bias from SMEM.  Result is a lane-dense row of
    # TILE_B values -> unmasked vector stores into the (1, 1, TILE_B) block.
    v = jnp.sum(h2 * w3_ref[...], axis=-1) + b3_ref[0, 0]          # (TB,)
    out_ref[0, 0, :] = v.astype(out_ref.dtype)


@functools.partial(jax.jit, static_argnames=("tile_b",))
def critic_forward(obs, params, tile_b=None):
    """Returns (values, state) exactly like CriticNetwork.forward (state=None)."""
    w1, b1, w2, b2, w3, b3 = params
    B = obs.shape[0]
    obs2d = obs.reshape(B, -1)                     # Net() flattens the obs
    D = obs2d.shape[1]
    H = w1.shape[1]

    # Batch tiling: big enough to amortize the ~0.35 us/grid-step overhead,
    # small enough that h1/h2 (tile_b x 64 f32) don't blow the vreg file, and
    # aiming for >= 2 grid steps so v7x's two TCs both get work.
    if tile_b is None:
        tile_b = min(_DEFAULT_TILE_B, max(128, _round_up(-(-B // 2), 128)))
        tile_b = min(tile_b, _round_up(B, 8))
    tile_b = max(8, _round_up(tile_b, 8))          # f32 sublane granularity
    grid_b = pl.cdiv(B, tile_b)                    # ragged last block is fine

    # Weights are tiny (<= 64x64); one-time bf16 cast in the wrapper is noise.
    w1_bf = w1.astype(jnp.bfloat16)
    w2_bf = w2.astype(jnp.bfloat16)
    b1_row = b1.reshape(1, H).astype(jnp.float32)
    b2_row = b2.reshape(1, H).astype(jnp.float32)
    w3_row = w3.reshape(1, H).astype(jnp.float32)  # value head as a lane row
    b3_s = b3.reshape(1, 1).astype(jnp.float32)    # scalar bias -> SMEM

    flops = 2 * B * (D * H + H * H + H)
    bytes_accessed = (B * D * 4                    # obs (f32, streamed)
                      + D * H * 2 + H * H * 2      # W1, W2 (bf16, resident)
                      + 3 * H * 4 + 4              # b1, b2, w3 row, b3
                      + grid_b * tile_b * 4)       # lane-dense output (f32)

    out = pl.pallas_call(
        _critic_kernel,
        out_shape=jax.ShapeDtypeStruct((grid_b, 1, tile_b), jnp.float32),
        grid=(grid_b,),
        in_specs=[
            pl.BlockSpec((tile_b, D), lambda i: (i, 0)),   # obs tile (streamed)
            pl.BlockSpec((D, H), lambda i: (0, 0)),        # W1 (resident)
            pl.BlockSpec((1, H), lambda i: (0, 0)),        # b1
            pl.BlockSpec((H, H), lambda i: (0, 0)),        # W2
            pl.BlockSpec((1, H), lambda i: (0, 0)),        # b2
            pl.BlockSpec((1, H), lambda i: (0, 0)),        # W3 row
            pl.BlockSpec(memory_space=pltpu.MemorySpace.SMEM),  # b3 scalar
        ],
        out_specs=pl.BlockSpec((1, 1, tile_b), lambda i: (i, 0, 0)),
        compiler_params=pltpu.CompilerParams(
            dimension_semantics=("parallel",)),            # megacore on v7x
        cost_estimate=pl.CostEstimate(
            flops=flops, transcendentals=0, bytes_accessed=bytes_accessed),
    )(obs2d, w1_bf, b1_row, w2_bf, b2_row, w3_row, b3_s)

    # Lane-dense (grid_b, 1, tile_b) -> (B, 1); reshape is metadata-only and
    # the slice only touches B*4 bytes (padding rows discarded).
    values = out.reshape(grid_b * tile_b)[:B].reshape(B, 1)
    return values, None


def init_params(key, state_dim, hidden=_HIDDEN):
    """Deterministic init mirroring nn.Linear's default U(-1/sqrt(fan_in), +)."""
    k1, k2, k3, k4, k5, k6 = jax.random.split(key, 6)

    def lin(kw, kb, fan_in, fan_out):
        bound = 1.0 / jnp.sqrt(jnp.float32(fan_in))
        w = jax.random.uniform(kw, (fan_in, fan_out), jnp.float32, -bound, bound)
        b = jax.random.uniform(kb, (1, fan_out), jnp.float32, -bound, bound)
        return w, b

    w1, b1 = lin(k1, k2, state_dim, hidden)   # Net layer 1
    w2, b2 = lin(k3, k4, hidden, hidden)      # Net layer 2
    w3, b3 = lin(k5, k6, hidden, 1)           # value_head
    return (w1, b1, w2, b2, w3, b3)


def _reference(obs, params):
    """Pure-JAX reference mirroring the kernel's bf16-MXU / f32-accumulate path."""
    w1, b1, w2, b2, w3, b3 = params
    x = obs.reshape(obs.shape[0], -1).astype(jnp.bfloat16)
    h1 = jnp.dot(x, w1.astype(jnp.bfloat16),
                 preferred_element_type=jnp.float32)
    h1 = jnp.maximum(h1 + b1.reshape(1, -1), 0.0)
    h2 = jnp.dot(h1.astype(jnp.bfloat16), w2.astype(jnp.bfloat16),
                 preferred_element_type=jnp.float32)
    h2 = jnp.maximum(h2 + b2.reshape(1, -1), 0.0)
    return (jnp.sum(h2 * w3.reshape(1, -1), axis=-1, keepdims=True)
            + b3.reshape(1, 1))


if __name__ == "__main__":
    key = jax.random.PRNGKey(0)
    k_obs, k_par = jax.random.split(key)

    B, STATE_DIM = 8, 16                        # small synthetic state_shape=(16,)
    obs = jax.random.normal(k_obs, (B, STATE_DIM), dtype=jnp.float32)
    params = init_params(k_par, STATE_DIM, hidden=_HIDDEN)

    values, state = critic_forward(obs, params)
    values = jax.block_until_ready(values)

    ref = _reference(obs, params)
    assert values.shape == (B, 1)
    assert state is None
    assert jnp.allclose(values, ref, atol=2e-3, rtol=2e-3)

    # Exercise multi-tile + ragged last block: B not a multiple of the tile.
    B2 = 300
    obs2 = jax.random.normal(jax.random.PRNGKey(1), (B2, STATE_DIM), jnp.float32)
    values2, _ = critic_forward(obs2, params, tile_b=128)   # grid of 3 tiles
    values2 = jax.block_until_ready(values2)
    ref2 = _reference(obs2, params)
    assert values2.shape == (B2, 1)
    assert jnp.allclose(values2, ref2, atol=2e-3, rtol=2e-3)

    # Default tile selection path (>=2 grid steps for mid-sized batches).
    values3, _ = critic_forward(obs2, params)
    values3 = jax.block_until_ready(values3)
    assert jnp.allclose(values3, ref2, atol=2e-3, rtol=2e-3)

    print("KERNEL_OK")
</pallas_src>

<mosaic_0001>
module attributes {stable_mosaic.version = 11 : i64} {
  func.func @_critic_kernel(%arg0: i32, %arg1: memref<8x16xf32, #tpu.memory_space<vmem>>, %arg2: memref<16x64xbf16, #tpu.memory_space<vmem>>, %arg3: memref<1x64xf32, #tpu.memory_space<vmem>>, %arg4: memref<64x64xbf16, #tpu.memory_space<vmem>>, %arg5: memref<1x64xf32, #tpu.memory_space<vmem>>, %arg6: memref<1x64xf32, #tpu.memory_space<vmem>>, %arg7: memref<1x1xf32, #tpu.memory_space<smem>>, %arg8: memref<1x1x8xf32, #tpu.memory_space<vmem>>) attributes {dimension_semantics = [#tpu.dimension_semantics<parallel>], iteration_bounds = array<i64: 1>, scalar_prefetch = 0 : i64, scratch_operands = 0 : i64, tpu.core_type = #tpu.core_type<tc>, window_params = [{transform_indices = @transform_0, window_bounds = array<i64: 8, 16>}, {pipeline_mode = #tpu.pipeline_mode<synchronous>, transform_indices = @transform_1, window_bounds = array<i64: 16, 64>}, {pipeline_mode = #tpu.pipeline_mode<synchronous>, transform_indices = @transform_2, window_bounds = array<i64: 1, 64>}, {pipeline_mode = #tpu.pipeline_mode<synchronous>, transform_indices = @transform_3, window_bounds = array<i64: 64, 64>}, {pipeline_mode = #tpu.pipeline_mode<synchronous>, transform_indices = @transform_4, window_bounds = array<i64: 1, 64>}, {pipeline_mode = #tpu.pipeline_mode<synchronous>, transform_indices = @transform_5, window_bounds = array<i64: 1, 64>}, {transform_indices = @transform_6, window_bounds = array<i64: 1, 1>}, {transform_indices = @transform_7, window_bounds = array<i64: 1, 1, 8>}]} {
    %c0 = arith.constant 0 : index
    %c0_0 = arith.constant 0 : index
    %0 = vector.load %arg1[%c0, %c0_0] : memref<8x16xf32, #tpu.memory_space<vmem>>, vector<8x16xf32>
    %1 = arith.truncf %0 : vector<8x16xf32> to vector<8x16xbf16>
    %c0_1 = arith.constant 0 : index
    %c0_2 = arith.constant 0 : index
    %2 = vector.load %arg2[%c0_1, %c0_2] : memref<16x64xbf16, #tpu.memory_space<vmem>>, vector<16x64xbf16>
    %cst = arith.constant dense<0.000000e+00> : vector<8x64xf32>
    %3 = tpu.matmul %1, %2, %cst {dimension_numbers = #tpu.dot_dimension_numbers<[1], [0], [0], [1], [0, 0, 1, 1], [], []>} : vector<8x16xbf16>, vector<16x64xbf16>, vector<8x64xf32> -> vector<8x64xf32>
    %c0_3 = arith.constant 0 : index
    %c0_4 = arith.constant 0 : index
    %4 = vector.load %arg3[%c0_3, %c0_4] : memref<1x64xf32, #tpu.memory_space<vmem>>, vector<1x64xf32>
    %5 = vector.broadcast %4 : vector<1x64xf32> to vector<8x64xf32>
    %6 = arith.addf %3, %5 : vector<8x64xf32>
    %cst_5 = arith.constant 0.000000e+00 : f32
    %7 = vector.broadcast %cst_5 : f32 to vector<8x64xf32>
    %8 = arith.maximumf %6, %7 : vector<8x64xf32>
    %9 = arith.truncf %8 : vector<8x64xf32> to vector<8x64xbf16>
    %c0_6 = arith.constant 0 : index
    %c0_7 = arith.constant 0 : index
    %10 = vector.load %arg4[%c0_6, %c0_7] : memref<64x64xbf16, #tpu.memory_space<vmem>>, vector<64x64xbf16>
    %cst_8 = arith.constant dense<0.000000e+00> : vector<8x64xf32>
    %11 = tpu.matmul %9, %10, %cst_8 {dimension_numbers = #tpu.dot_dimension_numbers<[1], [0], [0], [1], [0, 0, 1, 1], [], []>} : vector<8x64xbf16>, vector<64x64xbf16>, vector<8x64xf32> -> vector<8x64xf32>
    %c0_9 = arith.constant 0 : index
    %c0_10 = arith.constant 0 : index
    %12 = vector.load %arg5[%c0_9, %c0_10] : memref<1x64xf32, #tpu.memory_space<vmem>>, vector<1x64xf32>
    %13 = vector.broadcast %12 : vector<1x64xf32> to vector<8x64xf32>
    %14 = arith.addf %11, %13 : vector<8x64xf32>
    %cst_11 = arith.constant 0.000000e+00 : f32
    %15 = vector.broadcast %cst_11 : f32 to vector<8x64xf32>
    %16 = arith.maximumf %14, %15 : vector<8x64xf32>
    %c0_12 = arith.constant 0 : index
    %c0_13 = arith.constant 0 : index
    %17 = vector.load %arg6[%c0_12, %c0_13] : memref<1x64xf32, #tpu.memory_space<vmem>>, vector<1x64xf32>
    %18 = vector.broadcast %17 : vector<1x64xf32> to vector<8x64xf32>
    %19 = arith.mulf %16, %18 : vector<8x64xf32>
    %cst_14 = arith.constant dense<0.000000e+00> : vector<8xf32>
    %20 = vector.multi_reduction <add>, %19, %cst_14 [1] : vector<8x64xf32> to vector<8xf32>
    %c0_15 = arith.constant 0 : index
    %c0_16 = arith.constant 0 : index
    %21 = memref.load %arg7[%c0_15, %c0_16] : memref<1x1xf32, #tpu.memory_space<smem>>
    %22 = vector.broadcast %21 : f32 to vector<8xf32>
    %23 = arith.addf %20, %22 : vector<8xf32>
    %c0_17 = arith.constant 0 : index
    %c0_18 = arith.constant 0 : index
    %c0_19 = arith.constant 0 : index
    %24 = vector.load %arg8[%c0_17, %c0_18, %c0_19] : memref<1x1x8xf32, #tpu.memory_space<vmem>>, vector<1x1x8xf32>
    %25 = vector.shape_cast %24 : vector<1x1x8xf32> to vector<8xf32>
    %26 = vector.shape_cast %23 : vector<8xf32> to vector<1x1x8xf32>
    tpu.vector_store %arg8[%c0_17, %c0_18, %c0_19], %26 {strides = array<i32>} : memref<1x1x8xf32, #tpu.memory_space<vmem>>, vector<1x1x8xf32>,
    return
  }
  func.func @transform_0(%arg0: i32) -> (i32, i32) {
    %c0_i32 = arith.constant 0 : i32
    %c0_i32_0 = arith.constant 0 : i32
    return %arg0, %c0_i32 : i32, i32
  }
  func.func @transform_1(%arg0: i32) -> (i32, i32) {
    %c0_i32 = arith.constant 0 : i32
    %c0_i32_0 = arith.constant 0 : i32
    %c0_i32_1 = arith.constant 0 : i32
    return %c0_i32, %c0_i32_0 : i32, i32
  }
  func.func @transform_2(%arg0: i32) -> (i32, i32) {
    %c0_i32 = arith.constant 0 : i32
    %c0_i32_0 = arith.constant 0 : i32
    %c0_i32_1 = arith.constant 0 : i32
    return %c0_i32, %c0_i32_0 : i32, i32
  }
  func.func @transform_3(%arg0: i32) -> (i32, i32) {
    %c0_i32 = arith.constant 0 : i32
    %c0_i32_0 = arith.constant 0 : i32
    %c0_i32_1 = arith.constant 0 : i32
    return %c0_i32, %c0_i32_0 : i32, i32
  }
  func.func @transform_4(%arg0: i32) -> (i32, i32) {
    %c0_i32 = arith.constant 0 : i32
    %c0_i32_0 = arith.constant 0 : i32
    %c0_i32_1 = arith.constant 0 : i32
    return %c0_i32, %c0_i32_0 : i32, i32
  }
  func.func @transform_5(%arg0: i32) -> (i32, i32) {
    %c0_i32 = arith.constant 0 : i32
    %c0_i32_0 = arith.constant 0 : i32
    %c0_i32_1 = arith.constant 0 : i32
    return %c0_i32, %c0_i32_0 : i32, i32
  }
  func.func @transform_6(%arg0: i32) -> (i32, i32) {
    %c0_i32 = arith.constant 0 : i32
    %c0_i32_0 = arith.constant 0 : i32
    %c0_i32_1 = arith.constant 0 : i32
    return %c0_i32, %c0_i32_0 : i32, i32
  }
  func.func @transform_7(%arg0: i32) -> (i32, i32, i32) {
    %c0_i32 = arith.constant 0 : i32
    %c0_i32_0 = arith.constant 0 : i32
    %c0_i32_1 = arith.constant 0 : i32
    return %arg0, %c0_i32, %c0_i32_0 : i32, i32, i32
  }
}

</mosaic_0001>

<bundles_post_ra>
// kernel: critic_forward.1
= control target key start
LH: loop header
LB: loop body
LE: loop exit
PB: predicated region body
PF: predicated region fallthrough
CT: control target
= control target key end

     0   :  { %v281_v1 = vmov 0.0   ;;  %vm46_vm0 = vcmask 130048   ;;  %vm282_vm1 = vmmov 0   ;;  %s366_s0 = inlined_call_operand.vmem [shape: f32[8,16], index: 0, kind: input, shape index: {}]   ;;  %s367_s1 = inlined_call_operand.vmem [shape: bf16[16,64], index: 1, kind: input, shape index: {}]   ;;  %s368_s2 = inlined_call_operand.vmem [shape: f32[1,64], index: 2, kind: input, shape index: {}]   ;;  %s369_s3 = inlined_call_operand.vmem [shape: bf16[64,64], index: 3, kind: input, shape index: {}]   ;;  %s370_s4 = inlined_call_operand.vmem [shape: f32[1,64], index: 4, kind: input, shape index: {}]   ;;  %s371_s5 = inlined_call_operand.vmem [shape: f32[1,64], index: 5, kind: input, shape index: {}]   ;;  %s372_s6 = inlined_call_operand.<no memory space> [shape: f32[1,1], index: 6, kind: input, shape index: {}]   ;;  %s373_s7 = inlined_call_operand.hbm [shape: f32[1,1,8], index: 7, kind: output, shape index: {}]  }
   0x1   :  { %v252_v0 = vld [vmem:[%s367_s1] sm:$0xff]   ;;  %231 = vmatprep.subr.bf16.mxu0 %v281_v1  ;;  %237 = vmatprep.subr.bf16.mxu1 %v281_v1  ;;  %v254_v5 = vld [vmem:[%s369_s3 + $0x8] sm:$0xff]  }
   0x2   :  { %v29_v2 = vld [vmem:[%s366_s0] sm:$0xff]  ;;  %232 = vmatpush3.bf16.msra.mxu0 %v252_v0  ;;  %233 = vmatprep.mubr.msk.bf16.mxu0 %vm282_vm1, %v281_v1 }
   0x3   :  { %v253_v3 = vld [vmem:[%s369_s3] sm:$0xff]   ;;  %v30_v4 = vpack.c.bf16 %v29_v2, %v29_v2  ;;  %245 = vmatprep.mubr.msk.bf16.mxu1 %vm282_vm1, %v281_v1 }
   0x4   :  { %238 = vmatpush3.bf16.msra.mxu1 %v253_v3 }
   0x5   :  { %239 = vmatprep.subr.bf16.mxu1 %v281_v1  ;;  %234 = vmatmul.mubr.msk.bf16.vlgmr.msra.gmra.mrb[0].mxu0 %vm46_vm0, %v30_v4 }
   0x6   :  { %13 = vsyncpa [#allocation4], 0  ;;  %v255_v6 = vld [vmem:[%s369_s3 + $0x10] sm:$0xff]   ;;  %v256_v7 = vld [vmem:[%s369_s3 + $0x18] sm:$0xff]   ;;  %vm131_vm2 = vcmask 523264   ;;  %v191_v26 = vlaneseq  ;;  %v188_v29 = vstv %s372_s6  ;;  %vm198_vm3 = vcmask 57344  }
   0x7   :  { %v214_v8 = vld [vmem:[%s368_s2] ss:$0 sm:$0xff] }
   0x8   :  { %240 = vmatpush3.bf16.msra.mxu1 %v254_v5  ;;  %v217_v16 = vld [vmem:[%s370_s4] ss:$0 sm:$0xff]  ;;  %v192_v27 = vand.u32 127, %v191_v26  ;;  %v194_v28 = vshrl.u32 %v191_v26, 7  ;;  %s283_s4 = smov [#allocation3]  }
   0x9   :  { %241 = vmatprep.subr.bf16.mxu1 %v281_v1  ;;  %v223_v21 = vld [vmem:[%s371_s5] ss:$0 sm:$0xff]  ;;  %s206_s17 = sshll.u32 %s283_s4, 4  ;;  %s207_s17 = int_to_ptr.vmem [resolvable:$true] %s206_s17 }
   0xa   :  { %v195_v30 = vsub.s32 %v192_v27, %v194_v28  ;;  %s257_s5 = scalar_lea.vmem %s207_s17, 16  ;;  %s261_s18 = scalar_lea.vmem %s207_s17, 32 }
   0xb   :  { %p258_p0 = scmp.ne.s32.totalorder %s207_s17, %s257_s5  ;;  %p262_p1 = scmp.lt.s32.totalorder %s207_s17, %s207_s17 }
   0xc   :  { %242 = vmatpush3.bf16.msra.mxu1 %v255_v6  ;;  %p263_p2 = scmp.lt.s32.totalorder %s261_s18, %s257_s5 }
   0xd   :  { %243 = vmatprep.subr.bf16.mxu1 %v281_v1 }
   0xe   :  { %p264_p3 = por %p263_p2, %p262_p1 }
  0x10   :  { %244 = vmatpush3.bf16.msra.mxu1 %v256_v7  ;;  %p265_p4 = pnand %p264_p3, %p258_p0 }
  0xd8   :  { %v84_v9 = vpop.f32.mrb[0].mxu0 }
  0xd9   :  { %v85_v10 = vadd.f32 %v214_v8, %v84_v9  ;;  %v235_v11 = vpop.f32.mrb[1].mxu0 }
  0xda   :  { %v87_v12 = vpop.f32.mrb[2].mxu0 }
  0xdb   :  { %v90_v13 = vmax.f32 %v85_v10, 0.0  ;;  %v236_v14 = vpop.f32.mrb[3].mxu0 }
  0xdd   :  { %v91_v15 = vpack.c.bf16 %v90_v13, %v90_v13 }
  0xdf   :  { %246 = vmatmul.mubr.msk.bf16.vlgmr.msra.gmra.mrb[0].mxu1 %vm131_vm2, %v91_v15 }
 0x1b2   :  { %v169_v17 = vpop.f32.mrb[0].mxu1 }
 0x1b3   :  { %v170_v18 = vadd.f32 %v217_v16, %v169_v17  ;;  %v247_v19 = vpop.f32.mrb[1].mxu1 }
 0x1b4   :  { %v172_v20 = vpop.f32.mrb[2].mxu1 }
 0x1b5   :  { %v175_v22 = vmax.f32 %v170_v18, 0.0  ;;  %v248_v23 = vpop.f32.mrb[3].mxu1 }
 0x1b7   :  { %v183_v24 = vmul.f32 %v223_v21, %v175_v22 }
 0x1b9   :  { %v184_v25 = vsel %vm131_vm2, %v183_v24, 0.0 }
 0x1ba   :  { %185 = vadd.xlane.f32.xlu0 %v184_v25 }
 0x247   :  { %v186_v31 = vpop.xlane.xlu0 %185 }
 0x248   :  { %v189_v32 = vadd.f32 %v188_v29, %v186_v31 }
 0x24a   :  { %v196_v33 = vrot.slane %v189_v32, %v195_v30 }
 0x24c   :  { %199 = vst.msk [vmem:[#allocation3] sm:$0x1] %vm198_vm3, %v196_v33 }
 0x24d   :  { %268 = shalt.err (!%p265_p4)
}
 0x24e   :  { %s269_s6 = scalar_lea.hbm %s373_s7, 16 }
 0x24f   :  { %p270_p5 = scmp.ne.s32.totalorder %s373_s7, %s269_s6  ;;  %p273_p6 = scmp.lt.u32.totalorder %s269_s6, %s373_s7 }
 0x251   :  { %p275_p7 = pnand %p273_p6, %p270_p5 }
 0x253   :  { %278 = shalt.err (!%p275_p7)
}
 0x254   :  { %209 = dma.vmem_to_hbm [thread:$0]  %s207_s17, 16, %s373_s7, [#allocation4]  }
 0x255   :  { %279 = dma.done.wait [#allocation4], 16  }
 0x256   :  { %280 = vsyncadd [#allocation4], 4294967280 }
 0x257   :  { %213 = vsyncpa [#allocation4], 1 }

</bundles_post_ra>
